<compile_context>
chip_gen: v6e
topology: v6e:2x2x1
jax: 0.10.0
libtpu: 0.0.40
codegen_flags: <defaults>
</compile_context>

<pallas_src>
import functools

import jax
import jax.numpy as jnp
from jax.experimental import pallas as pl
from jax.experimental.pallas import tpu as pltpu

LEAKY_SLOPE = 0.01     # nn.LeakyReLU default negative_slope
BN_EPS = 1e-5          # nn.BatchNorm1d default eps
NUM_ACT = 3            # ['LeakyReLU', 'Sigmoid', 'Cos']
LANE = 128


def _round_up(n, m):
    return (n + m - 1) // m * m


# --------------------------------------------------------------------------
# Kernel: whole ensemble forward for one batch tile
# --------------------------------------------------------------------------
def ensemble_kernel(x_ref,
                    w1_ref, b1_ref,
                    w2_ref, b2_ref,
                    w3_ref, b3_ref,
                    wf_ref, bf_ref,
                    out_ref, acts_ref):
    hp = w1_ref.shape[1]                       # padded hidden width (count*L -> 128)

    x = x_ref[...].astype(jnp.bfloat16)        # (tb, F0) bf16 for the MXU
    # Layer 1: x shared across members -> one packed (tb,F0)x(F0,hp) matmul
    # (BatchNorm1 already folded into w1/b1; padded columns are exactly 0).
    h = jnp.dot(x, w1_ref[...], preferred_element_type=jnp.float32) + b1_ref[...]

    def act_layer(h, w_ref, b_ref):
        # MultiActivation + next Linear without the torch concat(dim=1):
        # leaky/sig/cos are written to 128-lane-aligned slots of a VMEM scratch
        # (plain stores) and consumed by ONE fused K=3*hp matmul.  The padded
        # hidden columns of h are exactly 0 (sigmoid->0.5, cos->1 there), but
        # the stacked weight has zero rows at those K positions, so their
        # contribution vanishes.
        acts_ref[:, 0 * hp:1 * hp] = jnp.where(h >= 0.0, h, LEAKY_SLOPE * h)  # VPU
        acts_ref[:, 1 * hp:2 * hp] = jax.nn.sigmoid(h)                        # EUP
        acts_ref[:, 2 * hp:3 * hp] = jnp.cos(h)                               # EUP
        acts = acts_ref[...].astype(jnp.bfloat16)
        return (jnp.dot(acts, w_ref[...], preferred_element_type=jnp.float32)
                + b_ref[...])

    # Layers 2 and 3: block-diagonal per-member weights, BN2/BN3 folded in.
    h = act_layer(h, w2_ref, b2_ref)           # (tb, hp)
    h = act_layer(h, w3_ref, b3_ref)           # (tb, hp)
    # Final Linear (no BatchNorm before it in the torch module).
    out_ref[...] = act_layer(h, wf_ref, bf_ref)  # (tb, np_out) lane-dense store


# --------------------------------------------------------------------------
# Parameter construction (stacked along the `count` axis, x @ W layout)
# --------------------------------------------------------------------------
def make_params(key, count, in_features, out_features, layer_size):
    H = layer_size * NUM_ACT

    def linear(k, fan_in, fan_out):
        kw, kb = jax.random.split(k)
        bound = 1.0 / jnp.sqrt(fan_in)
        w = jax.random.uniform(kw, (count, fan_in, fan_out), jnp.float32,
                               -bound, bound)
        b = jax.random.uniform(kb, (count, 1, fan_out), jnp.float32,
                               -bound, bound)
        return w, b

    def bn(k, feat):
        # rows: gamma, beta, running_mean, running_var (eval-mode BN)
        km, kv = jax.random.split(k)
        gamma = jnp.ones((count, 1, feat), jnp.float32)
        beta = jnp.zeros((count, 1, feat), jnp.float32)
        mean = 0.1 * jax.random.normal(km, (count, 1, feat), jnp.float32)
        var = 1.0 + 0.1 * jnp.abs(jax.random.normal(kv, (count, 1, feat),
                                                    jnp.float32))
        return jnp.concatenate([gamma, beta, mean, var], axis=1)   # (count,4,F)

    keys = jax.random.split(key, 8)
    params = {}
    params["bn1"] = bn(keys[0], in_features)
    params["w1"], params["b1"] = linear(keys[1], in_features, layer_size)
    params["bn2"] = bn(keys[2], H)
    params["w2"], params["b2"] = linear(keys[3], H, layer_size)
    params["bn3"] = bn(keys[4], H)
    params["w3"], params["b3"] = linear(keys[5], H, layer_size)
    params["wf"], params["bf"] = linear(keys[6], H, out_features)
    return params


# --------------------------------------------------------------------------
# ONE-TIME packing: BN fold, activation-split, block-diag, 128-lane pad, bf16.
# Runs at init (outside the jitted forward), never per call.
# --------------------------------------------------------------------------
def _fold_bn_into_linear(bn, w, b):
    # bn: (count, 4, feat)  w: (count, feat, out)  b: (count, 1, out)
    gamma, beta, mean, var = bn[:, 0], bn[:, 1], bn[:, 2], bn[:, 3]
    s = gamma * jax.lax.rsqrt(var + BN_EPS)             # (count, feat)
    t = beta - mean * s                                 # (count, feat)
    w_f = w * s[:, :, None]                             # diag(s) @ W
    b_f = b + jnp.einsum("cf,cfo->co", t, w)[:, None, :]
    return w_f, b_f


def _block_diag(blocks):
    # blocks: (count, K, N) -> block-diagonal (count*K, count*N)
    c, k, n = blocks.shape
    eye = jnp.eye(c, dtype=blocks.dtype)
    return jnp.einsum("cd,ckn->ckdn", eye, blocks).reshape(c * k, c * n)


def pack_params(params, count, out_features, layer_size,
                param_dtype=jnp.bfloat16):
    L = layer_size
    w1f, b1f = _fold_bn_into_linear(params["bn1"], params["w1"], params["b1"])
    w2f, b2f = _fold_bn_into_linear(params["bn2"], params["w2"], params["b2"])
    w3f, b3f = _fold_bn_into_linear(params["bn3"], params["w3"], params["b3"])
    wf, bf = params["wf"], params["bf"]

    hp = _round_up(count * L, LANE)                      # padded hidden width
    np_out = _round_up(count * out_features, LANE)       # padded output width
    F0 = w1f.shape[1]

    packed = {}
    # Layer 1: x is shared -> concat member outputs along the lane axis, pad.
    w1 = jnp.transpose(w1f, (1, 0, 2)).reshape(F0, count * L)
    packed["w1"] = jnp.pad(w1, ((0, 0), (0, hp - count * L))).astype(param_dtype)
    packed["b1"] = jnp.pad(b1f.reshape(1, count * L),
                           ((0, 0), (0, hp - count * L)))   # bias stays f32

    def pack_act_layer(w, b, n_out, n_pad):
        # w: (count, 3L, n_out). Split per activation, block-diagonalize over
        # members, zero-pad K->hp / N->n_pad, then stack [Wa;Wb;Wc] along K so
        # the whole layer is one (tb, 3*hp) x (3*hp, n_pad) matmul.
        parts = []
        for i in range(NUM_ACT):
            blk = _block_diag(w[:, i * L:(i + 1) * L, :])    # (count*L, count*n_out)
            blk = jnp.pad(blk, ((0, hp - count * L),
                                (0, n_pad - count * n_out)))
            parts.append(blk)
        w_stacked = jnp.concatenate(parts, axis=0).astype(param_dtype)  # (3*hp, n_pad)
        b_packed = jnp.pad(b.reshape(1, count * n_out),
                           ((0, 0), (0, n_pad - count * n_out)))        # f32
        return w_stacked, b_packed

    packed["w2"], packed["b2"] = pack_act_layer(w2f, b2f, L, hp)
    packed["w3"], packed["b3"] = pack_act_layer(w3f, b3f, L, hp)
    packed["wf"], packed["bf"] = pack_act_layer(wf, bf, out_features, np_out)
    return packed


# --------------------------------------------------------------------------
# Forward wrapper (jittable): takes the pre-packed parameters
# --------------------------------------------------------------------------
def agglomerative_forward(x, packed, *, count, out_features, tile_b=256):
    """Runs all `count` BeansModules over x.  Returns logits (count, B, out)."""
    B, F0 = x.shape
    hp = packed["w1"].shape[1]            # padded hidden width
    np_out = packed["bf"].shape[1]        # padded output width

    # Batch tiling: pad B to a sublane multiple, tile, mark axis parallel so
    # v7x can shard batch tiles across its 2 TensorCores (single step at B=8).
    b_pad = _round_up(B, 8)
    tb = min(tile_b, b_pad)
    b_pad = _round_up(b_pad, tb)
    if b_pad != B:
        x = jnp.pad(x, ((0, b_pad - B), (0, 0)))
    grid = (b_pad // tb,)

    def const_spec(arr):
        # Full-array weight/bias blocks; same block index every step -> stays
        # VMEM-resident across the batch loop (no re-DMA).
        return pl.BlockSpec(arr.shape, lambda i: (0, 0))

    args = (x,
            packed["w1"], packed["b1"],
            packed["w2"], packed["b2"],
            packed["w3"], packed["b3"],
            packed["wf"], packed["bf"])
    in_specs = [pl.BlockSpec((tb, F0), lambda i: (i, 0))]
    in_specs += [const_spec(a) for a in args[1:]]

    flat = pl.pallas_call(
        ensemble_kernel,
        out_shape=jax.ShapeDtypeStruct((b_pad, np_out), jnp.float32),
        grid=grid,
        in_specs=in_specs,
        out_specs=pl.BlockSpec((tb, np_out), lambda i: (i, 0)),
        scratch_shapes=[pltpu.VMEM((tb, NUM_ACT * hp), jnp.float32)],
        compiler_params=pltpu.CompilerParams(
            dimension_semantics=("parallel",)),
    )(*args)                                             # (b_pad, np_out)

    # Slice off batch / lane padding and un-pack the lane-dense slab to
    # per-member logits (plain JAX, outside the kernel).
    flat = flat[:B, :count * out_features]
    return flat.reshape(B, count, out_features).transpose(1, 0, 2)


# --------------------------------------------------------------------------
# Pure-JAX reference (unfused, matches the PyTorch module structure, f32)
# --------------------------------------------------------------------------
def reference_forward(x, params, count):
    def bn_apply(h, bn):
        gamma, beta, mean, var = bn[0], bn[1], bn[2], bn[3]
        return (h - mean) * jax.lax.rsqrt(var + BN_EPS) * gamma + beta

    def multi_act(h):
        return jnp.concatenate([jnp.where(h >= 0, h, LEAKY_SLOPE * h),
                                jax.nn.sigmoid(h),
                                jnp.cos(h)], axis=1)

    outs = []
    for c in range(count):
        h = x
        for bn_k, w_k, b_k in (("bn1", "w1", "b1"),
                               ("bn2", "w2", "b2"),
                               ("bn3", "w3", "b3")):
            h = bn_apply(h, params[bn_k][c])
            h = h @ params[w_k][c] + params[b_k][c]
            h = multi_act(h)
        outs.append(h @ params["wf"][c] + params["bf"][c])
    return jnp.stack(outs)


if __name__ == "__main__":
    # Shapes consistent with BeansModule(in_features=32, out_features=4,
    # ['LeakyReLU','Sigmoid','Cos'], count=3, layerSize=20, numLayers=3)
    # applied to a (batch=8, 32) pre-flattened input.
    batch = 8
    in_features = 32
    out_features = 4
    layer_size = 20
    count = 3

    key = jax.random.PRNGKey(0)
    kx, ky, kp = jax.random.split(key, 3)

    x = jax.random.normal(kx, (batch, in_features), jnp.float32)
    labels = jax.random.randint(ky, (batch,), 0, out_features)   # metrics-only input
    params = make_params(kp, count, in_features, out_features, layer_size)

    # ONE-TIME packing at init (hoisted out of the per-call path).
    packed = jax.block_until_ready(
        pack_params(params, count, out_features, layer_size))

    fwd = jax.jit(functools.partial(agglomerative_forward,
                                    count=count,
                                    out_features=out_features))
    logits = jax.block_until_ready(fwd(x, packed))               # (count, B, out)

    # Correctness check against the unfused f32 reference (weights are shipped
    # as bf16, so the tolerance is loosened accordingly).
    ref = jax.block_until_ready(reference_forward(x, params, count))
    max_err = float(jnp.max(jnp.abs(logits - ref)))
    assert logits.shape == (count, batch, out_features)
    assert max_err < 5e-2, f"mismatch vs reference: {max_err}"

    # eval branch of agglomerativeModel.forward: per-member argmax predictions.
    # TODO(synk): sklearn f1/precision/recall/confusion_matrix and the training
    # branch (autograd + Adam + StepLR) have no Pallas equivalent.
    preds = jax.block_until_ready(jnp.argmax(logits, axis=-1))   # (count, batch)
    assert preds.shape == (count, batch)
    print("KERNEL_OK")
</pallas_src>

<mosaic_0001>
module attributes {stable_mosaic.version = 11 : i64} {
  func.func @ensemble_kernel(%arg0: i32, %arg1: memref<8x32xf32, #tpu.memory_space<vmem>>, %arg2: memref<32x128xbf16, #tpu.memory_space<vmem>>, %arg3: memref<1x128xf32, #tpu.memory_space<vmem>>, %arg4: memref<384x128xbf16, #tpu.memory_space<vmem>>, %arg5: memref<1x128xf32, #tpu.memory_space<vmem>>, %arg6: memref<384x128xbf16, #tpu.memory_space<vmem>>, %arg7: memref<1x128xf32, #tpu.memory_space<vmem>>, %arg8: memref<384x128xbf16, #tpu.memory_space<vmem>>, %arg9: memref<1x128xf32, #tpu.memory_space<vmem>>, %arg10: memref<8x128xf32, #tpu.memory_space<vmem>>, %arg11: memref<8x384xf32, #tpu.memory_space<vmem>>) attributes {dimension_semantics = [#tpu.dimension_semantics<parallel>], iteration_bounds = array<i64: 1>, scalar_prefetch = 0 : i64, scratch_operands = 1 : i64, tpu.core_type = #tpu.core_type<tc>, window_params = [{transform_indices = @transform_0, window_bounds = array<i64: 8, 32>}, {pipeline_mode = #tpu.pipeline_mode<synchronous>, transform_indices = @transform_1, window_bounds = array<i64: 32, 128>}, {pipeline_mode = #tpu.pipeline_mode<synchronous>, transform_indices = @transform_2, window_bounds = array<i64: 1, 128>}, {pipeline_mode = #tpu.pipeline_mode<synchronous>, transform_indices = @transform_3, window_bounds = array<i64: 384, 128>}, {pipeline_mode = #tpu.pipeline_mode<synchronous>, transform_indices = @transform_4, window_bounds = array<i64: 1, 128>}, {pipeline_mode = #tpu.pipeline_mode<synchronous>, transform_indices = @transform_5, window_bounds = array<i64: 384, 128>}, {pipeline_mode = #tpu.pipeline_mode<synchronous>, transform_indices = @transform_6, window_bounds = array<i64: 1, 128>}, {pipeline_mode = #tpu.pipeline_mode<synchronous>, transform_indices = @transform_7, window_bounds = array<i64: 384, 128>}, {pipeline_mode = #tpu.pipeline_mode<synchronous>, transform_indices = @transform_8, window_bounds = array<i64: 1, 128>}, {transform_indices = @transform_9, window_bounds = array<i64: 8, 128>}]} {
    %c0 = arith.constant 0 : index
    %c0_0 = arith.constant 0 : index
    %0 = vector.load %arg1[%c0, %c0_0] : memref<8x32xf32, #tpu.memory_space<vmem>>, vector<8x32xf32>
    %1 = arith.truncf %0 : vector<8x32xf32> to vector<8x32xbf16>
    %c0_1 = arith.constant 0 : index
    %c0_2 = arith.constant 0 : index
    %2 = vector.load %arg2[%c0_1, %c0_2] : memref<32x128xbf16, #tpu.memory_space<vmem>>, vector<32x128xbf16>
    %cst = arith.constant dense<0.000000e+00> : vector<8x128xf32>
    %3 = tpu.matmul %1, %2, %cst {dimension_numbers = #tpu.dot_dimension_numbers<[1], [0], [0], [1], [0, 0, 1, 1], [], []>} : vector<8x32xbf16>, vector<32x128xbf16>, vector<8x128xf32> -> vector<8x128xf32>
    %c0_3 = arith.constant 0 : index
    %c0_4 = arith.constant 0 : index
    %4 = vector.load %arg3[%c0_3, %c0_4] : memref<1x128xf32, #tpu.memory_space<vmem>>, vector<1x128xf32>
    %5 = vector.broadcast %4 : vector<1x128xf32> to vector<8x128xf32>
    %6 = arith.addf %3, %5 : vector<8x128xf32>
    %cst_5 = arith.constant 0.000000e+00 : f32
    %7 = vector.broadcast %cst_5 : f32 to vector<8x128xf32>
    %8 = arith.cmpf oge, %6, %7 : vector<8x128xf32>
    %cst_6 = arith.constant 0.00999999977 : f32
    %9 = vector.broadcast %cst_6 : f32 to vector<8x128xf32>
    %10 = arith.mulf %9, %6 : vector<8x128xf32>
    %11 = arith.select %8, %6, %10 : vector<8x128xi1>, vector<8x128xf32>
    %c0_7 = arith.constant 0 : index
    %c0_8 = arith.constant 0 : index
    %12 = vector.load %arg11[%c0_7, %c0_8] : memref<8x384xf32, #tpu.memory_space<vmem>>, vector<8x128xf32>
    tpu.vector_store %arg11[%c0_7, %c0_8], %11 {strides = array<i32>} : memref<8x384xf32, #tpu.memory_space<vmem>>, vector<8x128xf32>,
    %13 = arith.negf %6 : vector<8x128xf32>
    %14 = math.exp %13 : vector<8x128xf32>
    %cst_9 = arith.constant 1.000000e+00 : f32
    %15 = vector.broadcast %cst_9 : f32 to vector<8x128xf32>
    %16 = arith.addf %15, %14 : vector<8x128xf32>
    %17 = arith.divf %15, %16 : vector<8x128xf32>
    %c0_10 = arith.constant 0 : index
    %c128 = arith.constant 128 : index
    %18 = vector.load %arg11[%c0_10, %c128] : memref<8x384xf32, #tpu.memory_space<vmem>>, vector<8x128xf32>
    tpu.vector_store %arg11[%c0_10, %c128], %17 {strides = array<i32>} : memref<8x384xf32, #tpu.memory_space<vmem>>, vector<8x128xf32>,
    %19 = math.cos %6 : vector<8x128xf32>
    %c0_11 = arith.constant 0 : index
    %c256 = arith.constant 256 : index
    %20 = vector.load %arg11[%c0_11, %c256] : memref<8x384xf32, #tpu.memory_space<vmem>>, vector<8x128xf32>
    tpu.vector_store %arg11[%c0_11, %c256], %19 {strides = array<i32>} : memref<8x384xf32, #tpu.memory_space<vmem>>, vector<8x128xf32>,
    %c0_12 = arith.constant 0 : index
    %c0_13 = arith.constant 0 : index
    %21 = vector.load %arg11[%c0_12, %c0_13] : memref<8x384xf32, #tpu.memory_space<vmem>>, vector<8x384xf32>
    %22 = arith.truncf %21 : vector<8x384xf32> to vector<8x384xbf16>
    %c0_14 = arith.constant 0 : index
    %c0_15 = arith.constant 0 : index
    %23 = vector.load %arg4[%c0_14, %c0_15] : memref<384x128xbf16, #tpu.memory_space<vmem>>, vector<384x128xbf16>
    %cst_16 = arith.constant dense<0.000000e+00> : vector<8x128xf32>
    %24 = tpu.matmul %22, %23, %cst_16 {dimension_numbers = #tpu.dot_dimension_numbers<[1], [0], [0], [1], [0, 0, 1, 1], [], []>} : vector<8x384xbf16>, vector<384x128xbf16>, vector<8x128xf32> -> vector<8x128xf32>
    %c0_17 = arith.constant 0 : index
    %c0_18 = arith.constant 0 : index
    %25 = vector.load %arg5[%c0_17, %c0_18] : memref<1x128xf32, #tpu.memory_space<vmem>>, vector<1x128xf32>
    %26 = vector.broadcast %25 : vector<1x128xf32> to vector<8x128xf32>
    %27 = arith.addf %24, %26 : vector<8x128xf32>
    %cst_19 = arith.constant 0.000000e+00 : f32
    %28 = vector.broadcast %cst_19 : f32 to vector<8x128xf32>
    %29 = arith.cmpf oge, %27, %28 : vector<8x128xf32>
    %cst_20 = arith.constant 0.00999999977 : f32
    %30 = vector.broadcast %cst_20 : f32 to vector<8x128xf32>
    %31 = arith.mulf %30, %27 : vector<8x128xf32>
    %32 = arith.select %29, %27, %31 : vector<8x128xi1>, vector<8x128xf32>
    %c0_21 = arith.constant 0 : index
    %c0_22 = arith.constant 0 : index
    %33 = vector.load %arg11[%c0_21, %c0_22] : memref<8x384xf32, #tpu.memory_space<vmem>>, vector<8x128xf32>
    tpu.vector_store %arg11[%c0_21, %c0_22], %32 {strides = array<i32>} : memref<8x384xf32, #tpu.memory_space<vmem>>, vector<8x128xf32>,
    %34 = arith.negf %27 : vector<8x128xf32>
    %35 = math.exp %34 : vector<8x128xf32>
    %cst_23 = arith.constant 1.000000e+00 : f32
    %36 = vector.broadcast %cst_23 : f32 to vector<8x128xf32>
    %37 = arith.addf %36, %35 : vector<8x128xf32>
    %38 = arith.divf %36, %37 : vector<8x128xf32>
    %c0_24 = arith.constant 0 : index
    %c128_25 = arith.constant 128 : index
    %39 = vector.load %arg11[%c0_24, %c128_25] : memref<8x384xf32, #tpu.memory_space<vmem>>, vector<8x128xf32>
    tpu.vector_store %arg11[%c0_24, %c128_25], %38 {strides = array<i32>} : memref<8x384xf32, #tpu.memory_space<vmem>>, vector<8x128xf32>,
    %40 = math.cos %27 : vector<8x128xf32>
    %c0_26 = arith.constant 0 : index
    %c256_27 = arith.constant 256 : index
    %41 = vector.load %arg11[%c0_26, %c256_27] : memref<8x384xf32, #tpu.memory_space<vmem>>, vector<8x128xf32>
    tpu.vector_store %arg11[%c0_26, %c256_27], %40 {strides = array<i32>} : memref<8x384xf32, #tpu.memory_space<vmem>>, vector<8x128xf32>,
    %c0_28 = arith.constant 0 : index
    %c0_29 = arith.constant 0 : index
    %42 = vector.load %arg11[%c0_28, %c0_29] : memref<8x384xf32, #tpu.memory_space<vmem>>, vector<8x384xf32>
    %43 = arith.truncf %42 : vector<8x384xf32> to vector<8x384xbf16>
    %c0_30 = arith.constant 0 : index
    %c0_31 = arith.constant 0 : index
    %44 = vector.load %arg6[%c0_30, %c0_31] : memref<384x128xbf16, #tpu.memory_space<vmem>>, vector<384x128xbf16>
    %cst_32 = arith.constant dense<0.000000e+00> : vector<8x128xf32>
    %45 = tpu.matmul %43, %44, %cst_32 {dimension_numbers = #tpu.dot_dimension_numbers<[1], [0], [0], [1], [0, 0, 1, 1], [], []>} : vector<8x384xbf16>, vector<384x128xbf16>, vector<8x128xf32> -> vector<8x128xf32>
    %c0_33 = arith.constant 0 : index
    %c0_34 = arith.constant 0 : index
    %46 = vector.load %arg7[%c0_33, %c0_34] : memref<1x128xf32, #tpu.memory_space<vmem>>, vector<1x128xf32>
    %47 = vector.broadcast %46 : vector<1x128xf32> to vector<8x128xf32>
    %48 = arith.addf %45, %47 : vector<8x128xf32>
    %cst_35 = arith.constant 0.000000e+00 : f32
    %49 = vector.broadcast %cst_35 : f32 to vector<8x128xf32>
    %50 = arith.cmpf oge, %48, %49 : vector<8x128xf32>
    %cst_36 = arith.constant 0.00999999977 : f32
    %51 = vector.broadcast %cst_36 : f32 to vector<8x128xf32>
    %52 = arith.mulf %51, %48 : vector<8x128xf32>
    %53 = arith.select %50, %48, %52 : vector<8x128xi1>, vector<8x128xf32>
    %c0_37 = arith.constant 0 : index
    %c0_38 = arith.constant 0 : index
    %54 = vector.load %arg11[%c0_37, %c0_38] : memref<8x384xf32, #tpu.memory_space<vmem>>, vector<8x128xf32>
    tpu.vector_store %arg11[%c0_37, %c0_38], %53 {strides = array<i32>} : memref<8x384xf32, #tpu.memory_space<vmem>>, vector<8x128xf32>,
    %55 = arith.negf %48 : vector<8x128xf32>
    %56 = math.exp %55 : vector<8x128xf32>
    %cst_39 = arith.constant 1.000000e+00 : f32
    %57 = vector.broadcast %cst_39 : f32 to vector<8x128xf32>
    %58 = arith.addf %57, %56 : vector<8x128xf32>
    %59 = arith.divf %57, %58 : vector<8x128xf32>
    %c0_40 = arith.constant 0 : index
    %c128_41 = arith.constant 128 : index
    %60 = vector.load %arg11[%c0_40, %c128_41] : memref<8x384xf32, #tpu.memory_space<vmem>>, vector<8x128xf32>
    tpu.vector_store %arg11[%c0_40, %c128_41], %59 {strides = array<i32>} : memref<8x384xf32, #tpu.memory_space<vmem>>, vector<8x128xf32>,
    %61 = math.cos %48 : vector<8x128xf32>
    %c0_42 = arith.constant 0 : index
    %c256_43 = arith.constant 256 : index
    %62 = vector.load %arg11[%c0_42, %c256_43] : memref<8x384xf32, #tpu.memory_space<vmem>>, vector<8x128xf32>
    tpu.vector_store %arg11[%c0_42, %c256_43], %61 {strides = array<i32>} : memref<8x384xf32, #tpu.memory_space<vmem>>, vector<8x128xf32>,
    %c0_44 = arith.constant 0 : index
    %c0_45 = arith.constant 0 : index
    %63 = vector.load %arg11[%c0_44, %c0_45] : memref<8x384xf32, #tpu.memory_space<vmem>>, vector<8x384xf32>
    %64 = arith.truncf %63 : vector<8x384xf32> to vector<8x384xbf16>
    %c0_46 = arith.constant 0 : index
    %c0_47 = arith.constant 0 : index
    %65 = vector.load %arg8[%c0_46, %c0_47] : memref<384x128xbf16, #tpu.memory_space<vmem>>, vector<384x128xbf16>
    %cst_48 = arith.constant dense<0.000000e+00> : vector<8x128xf32>
    %66 = tpu.matmul %64, %65, %cst_48 {dimension_numbers = #tpu.dot_dimension_numbers<[1], [0], [0], [1], [0, 0, 1, 1], [], []>} : vector<8x384xbf16>, vector<384x128xbf16>, vector<8x128xf32> -> vector<8x128xf32>
    %c0_49 = arith.constant 0 : index
    %c0_50 = arith.constant 0 : index
    %67 = vector.load %arg9[%c0_49, %c0_50] : memref<1x128xf32, #tpu.memory_space<vmem>>, vector<1x128xf32>
    %68 = vector.broadcast %67 : vector<1x128xf32> to vector<8x128xf32>
    %69 = arith.addf %66, %68 : vector<8x128xf32>
    %c0_51 = arith.constant 0 : index
    %c0_52 = arith.constant 0 : index
    %70 = vector.load %arg10[%c0_51, %c0_52] : memref<8x128xf32, #tpu.memory_space<vmem>>, vector<8x128xf32>
    tpu.vector_store %arg10[%c0_51, %c0_52], %69 {strides = array<i32>} : memref<8x128xf32, #tpu.memory_space<vmem>>, vector<8x128xf32>,
    return
  }
  func.func @transform_0(%arg0: i32) -> (i32, i32) {
    %c0_i32 = arith.constant 0 : i32
    %c0_i32_0 = arith.constant 0 : i32
    return %arg0, %c0_i32 : i32, i32
  }
  func.func @transform_1(%arg0: i32) -> (i32, i32) {
    %c0_i32 = arith.constant 0 : i32
    %c0_i32_0 = arith.constant 0 : i32
    %c0_i32_1 = arith.constant 0 : i32
    return %c0_i32, %c0_i32_0 : i32, i32
  }
  func.func @transform_2(%arg0: i32) -> (i32, i32) {
    %c0_i32 = arith.constant 0 : i32
    %c0_i32_0 = arith.constant 0 : i32
    %c0_i32_1 = arith.constant 0 : i32
    return %c0_i32, %c0_i32_0 : i32, i32
  }
  func.func @transform_3(%arg0: i32) -> (i32, i32) {
    %c0_i32 = arith.constant 0 : i32
    %c0_i32_0 = arith.constant 0 : i32
    %c0_i32_1 = arith.constant 0 : i32
    return %c0_i32, %c0_i32_0 : i32, i32
  }
  func.func @transform_4(%arg0: i32) -> (i32, i32) {
    %c0_i32 = arith.constant 0 : i32
    %c0_i32_0 = arith.constant 0 : i32
    %c0_i32_1 = arith.constant 0 : i32
    return %c0_i32, %c0_i32_0 : i32, i32
  }
  func.func @transform_5(%arg0: i32) -> (i32, i32) {
    %c0_i32 = arith.constant 0 : i32
    %c0_i32_0 = arith.constant 0 : i32
    %c0_i32_1 = arith.constant 0 : i32
    return %c0_i32, %c0_i32_0 : i32, i32
  }
  func.func @transform_6(%arg0: i32) -> (i32, i32) {
    %c0_i32 = arith.constant 0 : i32
    %c0_i32_0 = arith.constant 0 : i32
    %c0_i32_1 = arith.constant 0 : i32
    return %c0_i32, %c0_i32_0 : i32, i32
  }
  func.func @transform_7(%arg0: i32) -> (i32, i32) {
    %c0_i32 = arith.constant 0 : i32
    %c0_i32_0 = arith.constant 0 : i32
    %c0_i32_1 = arith.constant 0 : i32
    return %c0_i32, %c0_i32_0 : i32, i32
  }
  func.func @transform_8(%arg0: i32) -> (i32, i32) {
    %c0_i32 = arith.constant 0 : i32
    %c0_i32_0 = arith.constant 0 : i32
    %c0_i32_1 = arith.constant 0 : i32
    return %c0_i32, %c0_i32_0 : i32, i32
  }
  func.func @transform_9(%arg0: i32) -> (i32, i32) {
    %c0_i32 = arith.constant 0 : i32
    %c0_i32_0 = arith.constant 0 : i32
    return %arg0, %c0_i32 : i32, i32
  }
}

</mosaic_0001>

<bundles_post_ra>
// kernel: agglomerative_forward.1
= control target key start
LH: loop header
LB: loop body
LE: loop exit
PB: predicated region body
PF: predicated region fallthrough
CT: control target
= control target key end

     0   :  { %14 = vsyncpa [#allocation4], 0  ;;  %s2114_s0 = inlined_call_operand.hbm [shape: f32[8,32], index: 0, kind: input, shape index: {}]   ;;  %s2115_s1 = inlined_call_operand.hbm [shape: bf16[32,128], index: 1, kind: input, shape index: {}]   ;;  %s2116_s2 = inlined_call_operand.vmem [shape: f32[1,128], index: 2, kind: input, shape index: {}]   ;;  %s2117_s3 = inlined_call_operand.hbm [shape: bf16[384,128], index: 3, kind: input, shape index: {}]   ;;  %s2118_s4 = inlined_call_operand.vmem [shape: f32[1,128], index: 4, kind: input, shape index: {}]   ;;  %s2119_s5 = inlined_call_operand.hbm [shape: bf16[384,128], index: 5, kind: input, shape index: {}]   ;;  %s2120_s6 = inlined_call_operand.vmem [shape: f32[1,128], index: 6, kind: input, shape index: {}]   ;;  %s2121_s7 = inlined_call_operand.hbm [shape: bf16[384,128], index: 7, kind: input, shape index: {}]   ;;  %s2122_s8 = inlined_call_operand.vmem [shape: f32[1,128], index: 8, kind: input, shape index: {}]   ;;  %s2123_s9 = inlined_call_operand.vmem [shape: f32[8,128], index: 9, kind: output, shape index: {}]  }
   0x1   :  { %15 = vsyncpa [#allocation6], 0 }
   0x2   :  { %16 = vsyncpa [#allocation9], 0  ;;  %s1865_s30 = smov [#allocation5]  }
   0x3   :  { %s32_s10 = sshll.u32 %s1865_s30, 4  ;;  %s33_s10 = int_to_ptr.vmem [resolvable:$true] %s32_s10 }
   0x4   :  { %s1767_s11 = scalar_lea.vmem %s33_s10, 256  ;;  %p1772_p1 = scmp.lt.s32.totalorder %s33_s10, %s33_s10 }
   0x5   :  { %p1768_p0 = scmp.ne.s32.totalorder %s33_s10, %s1767_s11  ;;  %p1773_p2 = scmp.lt.s32.totalorder %s1767_s11, %s1767_s11 }
   0x7   :  { %p1774_p3 = por %p1773_p2, %p1772_p1 }
   0x9   :  { %p1775_p4 = pnand %p1774_p3, %p1768_p0 }
   0xb   :  { %1778 = shalt.err (!%p1775_p4)
}
   0xc   :  { %s1866_s12 = smov 64   ;;  %s1867_s13 = smov 4  }
   0xd   :  { %38 = dma.hbm_to_vmem [thread:$0]  %s2115_s1, 256, %s33_s10, [#allocation6], %s1866_s12, %s1866_s12, %s1867_s13  }
   0xe   :  { %s1868_s16 = smov [#allocation8]   ;;  %s1869_s18 = smov [#allocation3]  }
   0xf   :  { %s60_s17 = sshll.u32 %s1868_s16, 4  ;;  %s23_s19 = sshll.u32 %s1869_s18, 4  ;;  %s61_s17 = int_to_ptr.vmem [resolvable:$true] %s60_s17  ;;  %s24_s19 = int_to_ptr.vmem [resolvable:$true] %s23_s19 }
  0x10   :  { %s1787_s20 = scalar_lea.vmem %s61_s17, 3072  ;;  %p1792_p6 = scmp.lt.s32.totalorder %s61_s17, %s61_s17 }
  0x11   :  { %p1788_p5 = scmp.ne.s32.totalorder %s61_s17, %s1787_s20  ;;  %p1793_p7 = scmp.lt.s32.totalorder %s1787_s20, %s1787_s20 }
  0x13   :  { %p1794_p8 = por %p1793_p7, %p1792_p6 }
  0x15   :  { %p1795_p9 = pnand %p1794_p8, %p1788_p5 }
  0x17   :  { %1798 = shalt.err (!%p1795_p9)
}
  0x18   :  { %66 = dma.hbm_to_vmem [thread:$0]  %s2119_s5, 3072, %s61_s17, [#allocation9], %s1866_s12, %s1866_s12, %s1867_s13  }
  0x19   :  { %s1807_s1 = scalar_lea.vmem %s24_s19, 128  ;;  %p1812_p11 = scmp.lt.s32.totalorder %s24_s19, %s24_s19 }
  0x1a   :  { %p1808_p10 = scmp.ne.s32.totalorder %s24_s19, %s1807_s1  ;;  %p1813_p12 = scmp.lt.s32.totalorder %s1807_s1, %s1807_s1 }
  0x1c   :  { %p1814_p13 = por %p1813_p12, %p1812_p11 }
  0x1e   :  { %p1815_p0 = pnand %p1814_p13, %p1808_p10 }
  0x20   :  { %1818 = shalt.err (!%p1815_p0)
}
  0x21   :  { %26 = dma.hbm_to_vmem [thread:$0]  %s2114_s0, 128, %s24_s19, [#allocation4]  }
  0x22   :  { %s1870_s25 = smov [#allocation7]   ;;  %s1871_s27 = smov [#allocation10]  }
  0x23   :  { %s46_s26 = sshll.u32 %s1870_s25, 4  ;;  %s74_s28 = sshll.u32 %s1871_s27, 4  ;;  %s47_s26 = int_to_ptr.vmem [resolvable:$true] %s46_s26  ;;  %s75_s28 = int_to_ptr.vmem [resolvable:$true] %s74_s28 }
  0x24   :  { %s1827_s29 = scalar_lea.vmem %s47_s26, 3072  ;;  %p1832_p2 = scmp.lt.s32.totalorder %s47_s26, %s47_s26 }
  0x25   :  { %p1828_p1 = scmp.ne.s32.totalorder %s47_s26, %s1827_s29  ;;  %p1833_p3 = scmp.lt.s32.totalorder %s1827_s29, %s1827_s29 }
  0x27   :  { %p1834_p4 = por %p1833_p3, %p1832_p2 }
  0x29   :  { %p1835_p5 = pnand %p1834_p4, %p1828_p1 }
  0x2b   :  { %1838 = shalt.err (!%p1835_p5)
}
  0x2c   :  { %52 = dma.hbm_to_vmem [thread:$0]  %s2117_s3, 3072, %s47_s26, [#allocation6], %s1866_s12, %s1866_s12, %s1867_s13  }
  0x2d   :  { %s1847_s0 = scalar_lea.vmem %s75_s28, 3072  ;;  %p1852_p7 = scmp.lt.s32.totalorder %s75_s28, %s75_s28 }
  0x2e   :  { %p1848_p6 = scmp.ne.s32.totalorder %s75_s28, %s1847_s0  ;;  %p1853_p8 = scmp.lt.s32.totalorder %s1847_s0, %s1847_s0 }
  0x30   :  { %p1854_p9 = por %p1853_p8, %p1852_p7 }
  0x32   :  { %p1855_p10 = pnand %p1854_p9, %p1848_p6 }
  0x34   :  { %1858 = shalt.err (!%p1855_p10)
}
  0x35   :  { %80 = dma.hbm_to_vmem [thread:$0]  %s2121_s7, 3072, %s75_s28, [#allocation9], %s1866_s12, %s1866_s12, %s1867_s13  }
  0x36   :  { %1859 = dma.done.wait [#allocation4], 128  }
  0x37   :  { %1860 = vsyncadd [#allocation4], 4294967168 }
  0x38   :  { %1861 = dma.done.wait [#allocation6], 3328  }
  0x39   :  { %1862 = vsyncadd [#allocation6], 4294963968 }
  0x3a   :  { %1863 = dma.done.wait [#allocation9], 6144  }
  0x3b   :  { %1864 = vsyncadd [#allocation9], 4294961152  ;;  %v1872_v0 = vmov 0.0   ;;  %vm1873_vm0 = vmmov 0   ;;  %v1661_v1 = vld [vmem:[#allocation5 + $0x8] sm:$0xff]   ;;  %v1662_v2 = vld [vmem:[#allocation5] sm:$0xff]  }
  0x3c   :  { %1566 = vmatprep.subr.bf16.mxu0 %v1872_v0  ;;  %1570 = vmatprep.mubr.msk.bf16.mxu0 %vm1873_vm0, %v1872_v0  ;;  %v99_v3 = vld [vmem:[#allocation3] sm:$0xff]  ;;  %vm124_vm1 = vcmask 261120   ;;  %v1663_v5 = vld [vmem:[#allocation7 + $0x78] sm:$0xff]   ;;  %v1665_v7 = vld [vmem:[#allocation7 + $0x70] sm:$0xff]   ;;  %v1874_v47 = vmov 683565275  }
  0x3d   :  { %1567 = vmatpush3.bf16.msra.mxu0 %v1661_v1  ;;  %v100_v4 = vpack.c.bf16 %v99_v3, %v99_v3  ;;  %v1664_v6 = vld [vmem:[#allocation7 + $0x38] sm:$0xff]   ;;  %1473 = vmatprep.subr.bf16.mxu1 %v1663_v5  ;;  %v1666_v8 = vld [vmem:[#allocation7 + $0x30] sm:$0xff]   ;;  %v1667_v9 = vld [vmem:[#allocation7 + $0x68] sm:$0xff]   ;;  %v1875_v49 = vmov 2475754826  }
  0x3e   :  { %1568 = vmatprep.subr.bf16.mxu0 %v1872_v0  ;;  %1474 = vmatpush3.bf16.msra.mxu1 %v1664_v6  ;;  %v1668_v10 = vld [vmem:[#allocation7 + $0x28] sm:$0xff]   ;;  %v1669_v11 = vld [vmem:[#allocation7 + $0x60] sm:$0xff]   ;;  %v1671_v13 = vld [vmem:[#allocation7 + $0x58] sm:$0xff]   ;;  %v1876_v52 = vmov 2131351028  }
  0x3f   :  { %1475 = vmatprep.subr.bf16.mxu1 %v1665_v7  ;;  %v1670_v12 = vld [vmem:[#allocation7 + $0x20] sm:$0xff]   ;;  %v1672_v14 = vld [vmem:[#allocation7 + $0x18] sm:$0xff]   ;;  %v1673_v15 = vld [vmem:[#allocation7 + $0x50] sm:$0xff]   ;;  %v1877_v55 = vmov 2102212464  }
  0x40   :  { %v1674_v16 = vld [vmem:[#allocation7 + $0x10] sm:$0xff]   ;;  %v1675_v17 = vld [vmem:[#allocation7 + $0x48] sm:$0xff]   ;;  %v1677_v19 = vld [vmem:[#allocation7 + $0x40] sm:$0xff]   ;;  %v1878_v59 = vmov 920167782  }
  0x41   :  { %1569 = vmatpush3.bf16.msra.mxu0 %v1662_v2  ;;  %v1676_v18 = vld [vmem:[#allocation7 + $0x8] sm:$0xff]   ;;  %v1678_v20 = vld [vmem:[#allocation7] sm:$0xff]   ;;  %v1679_v21 = vld [vmem:[#allocation7 + $0xb8] sm:$0xff]   ;;  %v1879_v62 = vmov 1326507024  }
  0x42   :  { %1574 = vmatprep.subr.bf16.mxu0 %v1872_v0  ;;  %1476 = vmatpush3.bf16.msra.mxu1 %v1666_v8  ;;  %v1680_v22 = vld [vmem:[#allocation7 + $0xb0] sm:$0xff]   ;;  %v1681_v23 = vld [vmem:[#allocation7 + $0xa8] sm:$0xff]   ;;  %v1682_v24 = vld [vmem:[#allocation7 + $0xa0] sm:$0xff]  }
  0x43   :  { %1477 = vmatprep.subr.bf16.mxu1 %v1667_v9  ;;  %v1683_v25 = vld [vmem:[#allocation7 + $0x98] sm:$0xff]   ;;  %v1684_v26 = vld [vmem:[#allocation7 + $0x90] sm:$0xff]   ;;  %v1685_v27 = vld [vmem:[#allocation7 + $0x88] sm:$0xff]  }
  0x44   :  { %1571 = vmatmul.mubr.msk.bf16.vlgmr.msra.gmra.mxu0 %vm124_vm1, %v100_v4  ;;  %v1686_v28 = vld [vmem:[#allocation7 + $0x80] sm:$0xff]   ;;  %v1376_v29 = vld [vmem:[%s2116_s2] ss:$0 sm:$0xff] }
  0x45   :  { %1590 = vmatprep.mubr.msk.bf16.mxu0 %vm1873_vm0, %v1872_v0  ;;  %1575 = vmatpush3.bf16.msra.mxu0 %v1679_v21 }
  0x46   :  { %1478 = vmatpush3.bf16.msra.mxu1 %v1668_v10  ;;  %1576 = vmatprep.subr.bf16.mxu0 %v1872_v0 }
  0x47   :  { %1479 = vmatprep.subr.bf16.mxu1 %v1669_v11 }
  0x49   :  { %1577 = vmatpush3.bf16.msra.mxu0 %v1680_v22 }
  0x4a   :  { %1480 = vmatpush3.bf16.msra.mxu1 %v1670_v12  ;;  %1578 = vmatprep.subr.bf16.mxu0 %v1872_v0 }
  0x4b   :  { %1481 = vmatprep.subr.bf16.mxu1 %v1671_v13 }
  0x4d   :  { %1579 = vmatpush3.bf16.msra.mxu0 %v1681_v23 }
  0x4e   :  { %1482 = vmatpush3.bf16.msra.mxu1 %v1672_v14  ;;  %1580 = vmatprep.subr.bf16.mxu0 %v1872_v0 }
  0x4f   :  { %1483 = vmatprep.subr.bf16.mxu1 %v1673_v15 }
  0x51   :  { %1581 = vmatpush3.bf16.msra.mxu0 %v1682_v24 }
  0x52   :  { %1484 = vmatpush3.bf16.msra.mxu1 %v1674_v16  ;;  %1582 = vmatprep.subr.bf16.mxu0 %v1872_v0 }
  0x53   :  { %1485 = vmatprep.subr.bf16.mxu1 %v1675_v17 }
  0x55   :  { %1583 = vmatpush3.bf16.msra.mxu0 %v1683_v25 }
  0x56   :  { %1486 = vmatpush3.bf16.msra.mxu1 %v1676_v18  ;;  %1584 = vmatprep.subr.bf16.mxu0 %v1872_v0 }
  0x57   :  { %1487 = vmatprep.subr.bf16.mxu1 %v1677_v19 }
  0x59   :  { %1585 = vmatpush3.bf16.msra.mxu0 %v1684_v26 }
  0x5a   :  { %1488 = vmatpush3.bf16.msra.mxu1 %v1678_v20  ;;  %1586 = vmatprep.subr.bf16.mxu0 %v1872_v0 }
  0x5d   :  { %1587 = vmatpush3.bf16.msra.mxu0 %v1685_v27 }
  0x5e   :  { %1588 = vmatprep.subr.bf16.mxu0 %v1872_v0 }
  0x61   :  { %1589 = vmatpush3.bf16.msra.mxu0 %v1686_v28 }
  0x62   :  { %1594 = vmatprep.subr.bf16.mxu0 %v1872_v0 }
 0x104   :  { %v162_v30 = vpop.f32.mrf.mxu0 }
 0x105   :  { %v1975_v31 = vadd.f32 %v1376_v29, %v162_v30 }
 0x106   :  { %v1572_v32 = vpop.f32.mrf.mxu0 }
 0x107   :  { %v182_v33 = vand.u32 2139095040, %v1975_v31  ;;  %v1380_v34 = vmul.f32 -1.442695, %v1975_v31  ;;  %v179_v39 = vand.u32 2147483647, %v1975_v31  ;;  %vm168_vm8 = vcmp.ge.f32.partialorder %v1975_v31, 0.0 }
 0x108   :  { %v165_v35 = vpop.f32.mrf.mxu0  ;;  %v169_v25 = vmul.f32 0.01, %v1975_v31  ;;  %vm181_vm10 = vcmp.lt.s32.totalorder %v1975_v31, 0  ;;  %vm271_vm15 = vweird.f32 %v1975_v31 }
 0x109   :  { %1735 = vpow2.f32 %v1380_v34  ;;  %v183_v36 = vshrl.u32 %v182_v33, 23  ;;  %v186_v41 = vand.u32 8388607, %v179_v39  ;;  %vm180_vm11 = vcmp.le.f32.partialorder %v179_v39, 0.7853982 }
 0x10a   :  { %v1573_v37 = vpop.f32.mrf.mxu0  ;;  %v170_v30 = vsel %vm168_vm8, %v1975_v31, %v169_v25  ;;  %v1698_v25 = vld [vmem:[#allocation8 + $0x10] sm:$0xff]  }
 0x10b   :  { %v1381_v38 = vadd.s32 4294967169, %v183_v36  ;;  %v187_v45 = vor.u32 8388608, %v186_v41  ;;  %v286_v35 = vpack.c.bf16 %v170_v30, %v170_v30  ;;  %v1703_v30 = vld [vmem:[#allocation8 + $0xb8] sm:$0xff]  }
 0x10d   :  { %v189_v40 = vadd.s32 1, %v1381_v38  ;;  %v227_v15 = vshll.u32 %v187_v45, 8 }
 0x10f   :  { %vm190_vm2 = vcmp.gt.s32.totalorder %v189_v40, 0 }
 0x110   :  { %v191_v42 = vsel %vm190_vm2, %v189_v40, 0 }
 0x111   :  { %v193_v43 = vand.u32 31, %v191_v42  ;;  %v192_v46 = vshrl.u32 %v191_v42, 5 }
 0x113   :  { %v194_v44 = vsub.s32 32, %v193_v43  ;;  %v196_v48 = vshll.u32 %v1874_v47, %v193_v43  ;;  %v199_v50 = vshll.u32 %v1875_v49, %v193_v43  ;;  %v202_v54 = vshll.u32 %v1876_v52, %v193_v43 }
 0x114   :  { %v205_v58 = vshll.u32 %v1877_v55, %v193_v43  ;;  %v208_v61 = vshll.u32 %v1878_v59, %v193_v43  ;;  %vm211_vm3 = vcmp.lt.s32.totalorder %v192_v46, 1  ;;  %vm214_vm4 = vcmp.lt.s32.totalorder %v192_v46, 4 }
 0x115   :  { %v197_v51 = vshrl.u32 %v1875_v49, %v194_v44  ;;  %v200_v53 = vshrl.u32 %v1876_v52, %v194_v44  ;;  %v203_v56 = vshrl.u32 %v1877_v55, %v194_v44  ;;  %v206_v60 = vshrl.u32 %v1878_v59, %v194_v44 }
 0x116   :  { %v1736_v57 = vpop.eup %1735  ;;  %v209_v63 = vshrl.u32 %v1879_v62, %v194_v44  ;;  %v195_v7 = vshrl.u32 %v1874_v47, %v194_v44  ;;  %vm213_vm5 = vcmp.lt.s32.totalorder %v192_v46, 3  ;;  %vm212_vm6 = vcmp.lt.s32.totalorder %v192_v46, 2 }
 0x117   :  { %v175_v1 = vadd.f32 1.0, %v1736_v57  ;;  %v198_v2 = vor.u32 %v197_v51, %v196_v48  ;;  %v201_v3 = vor.u32 %v200_v53, %v199_v50  ;;  %v204_v4 = vor.u32 %v203_v56, %v202_v54 }
 0x118   :  { %v207_v5 = vor.u32 %v206_v60, %v205_v58  ;;  %v210_v6 = vor.u32 %v209_v63, %v208_v61 }
 0x119   :  { %1737 = vrcp.f32 %v175_v1  ;;  %v216_v8 = vsel %vm214_vm4, %v204_v4, 2102212464  ;;  %v219_v9 = vsel %vm211_vm3, %v198_v2, %v201_v3  ;;  %v223_v11 = vsel %vm211_vm3, %v201_v3, %v204_v4 }
 0x11a   :  { %v220_v10 = vsel %vm214_vm4, %v207_v5, 920167782  ;;  %v224_v12 = vsel %vm214_vm4, %v210_v6, 1326507024  ;;  %v215_v16 = vsel %vm211_vm3, %v195_v7, %v198_v2  ;;  %v217_v17 = vsel %vm213_vm5, %v201_v3, %v216_v8 }
 0x11b   :  { %v221_v13 = vsel %vm213_vm5, %v204_v4, %v220_v10  ;;  %v225_v14 = vsel %vm213_vm5, %v207_v5, %v224_v12  ;;  %v218_v24 = vsel %vm212_vm6, %v215_v16, %v217_v17  ;;  %v1688_v16 = vld [vmem:[#allocation8 + $0x38] sm:$0xff]   ;;  %v1689_v17 = vld [vmem:[#allocation8 + $0x70] sm:$0xff]  }
 0x11c   :  { %v222_v18 = vsel %vm212_vm6, %v219_v9, %v221_v13  ;;  %v226_v19 = vsel %vm212_vm6, %v223_v11, %v225_v14  ;;  %v234_v27 = vmul.u32 %v227_v15, %v218_v24  ;;  %v1697_v24 = vld [vmem:[#allocation8 + $0x50] sm:$0xff]  }
 0x11d   :  { %v1993_v20 = vmul.u32.u64.low %v227_v15, %v226_v19  ;;  %v1994_v21 = vmul.u32.u64.high %v227_v15, %v226_v19, %v1993_v20  ;;  %v1996_v22 = vmul.u32.u64.low %v227_v15, %v222_v18  ;;  %v1997_v23 = vmul.u32.u64.high %v227_v15, %v222_v18, %v1996_v22  ;;  %v1687_v15 = vld [vmem:[#allocation8 + $0x78] sm:$0xff]   ;;  %v1690_v18 = vld [vmem:[#allocation8 + $0x30] sm:$0xff]   ;;  %v1691_v19 = vld [vmem:[#allocation8 + $0x68] sm:$0xff]  }
 0x11e   :  { %1504 = vmatprep.subr.bf16.mxu1 %v1687_v15  ;;  %v1692_v20 = vld [vmem:[#allocation8 + $0x28] sm:$0xff]  }
 0x11f   :  { %vm236_vm7 = vc.u32 %v1994_v21, %v1996_v22  ;;  %v237_v26 = vadd.s32 1, %v1997_v23  ;;  %v235_v45 = vadd.s32 %v1996_v22, %v1994_v21  ;;  %v1693_v21 = vld [vmem:[#allocation8 + $0x60] sm:$0xff]   ;;  %v1695_v22 = vld [vmem:[#allocation8 + $0x58] sm:$0xff]  }
 0x121   :  { %v238_v28 = vsel %vm236_vm7, %v237_v26, %v1997_v23  ;;  %v1696_v23 = vld [vmem:[#allocation8 + $0x18] sm:$0xff]   ;;  %v1699_v26 = vld [vmem:[#allocation8 + $0x48] sm:$0xff]  }
 0x122   :  { %v239_v29 = vadd.s32 %v238_v28, %v234_v27  ;;  %v1700_v27 = vld [vmem:[#allocation8 + $0x8] sm:$0xff]   ;;  %v1701_v28 = vld [vmem:[#allocation8 + $0x40] sm:$0xff]  }
 0x124   :  { %v240_v33 = vadd.s32 536870912, %v239_v29 }
 0x126   :  { %v1738_v32 = vpop.eup %1737  ;;  %v241_v36 = vshrl.u32 %v240_v33, 30  ;;  %v1705_v33 = vld [vmem:[#allocation8 + $0xa8] sm:$0xff]  }
 0x127   :  { %v287_v34 = vpack.c.bf16 %v1738_v32, %v1738_v32  ;;  %v1704_v32 = vld [vmem:[#allocation8 + $0xb0] sm:$0xff]  }
 0x128   :  { %v242_v37 = vshll.u32 %v241_v36, 30  ;;  %v265_v3 = vsub.s32 4, %v241_v36 }
 0x129   :  { %520 = vmatprep.mubr.bf16.mxu1 %v287_v34  ;;  %v1706_v34 = vld [vmem:[#allocation8 + $0xa0] sm:$0xff]  }
 0x12a   :  { %521 = vmatmul.mubr.bf16.vlgmr.msra.gmra.mxu1 %v286_v35  ;;  %v243_v38 = vsub.s32 %v239_v29, %v242_v37  ;;  %v266_v4 = vsel %vm181_vm10, %v265_v3, %v241_v36  ;;  %v1702_v29 = vld [vmem:[#allocation8] sm:$0xff]   ;;  %v1707_v35 = vld [vmem:[#allocation8 + $0x98] sm:$0xff]   ;;  %v1708_v36 = vld [vmem:[#allocation8 + $0x90] sm:$0xff]  }
 0x12b   :  { %v268_v5 = vsel %vm180_vm11, 0, %v266_v4  ;;  %1505 = vmatpush3.bf16.msra.mxu1 %v1688_v16  ;;  %v1709_v37 = vld [vmem:[#allocation8 + $0x88] sm:$0xff]  }
 0x12c   :  { %v245_v40 = vsub.s32 0, %v243_v38  ;;  %v272_v6 = vand.u32 3, %v268_v5  ;;  %1506 = vmatprep.subr.bf16.mxu1 %v1689_v17 }
 0x12e   :  { %v1382_v41 = vmin.u32 %v245_v40, %v243_v38  ;;  %vm277_vm12 = vcmp.eq.s32.totalorder %v272_v6, 2  ;;  %vm274_vm13 = vcmp.eq.s32.totalorder %v272_v6, 0  ;;  %vm273_vm14 = vcmp.lt.s32.totalorder %v272_v6, 2 }
 0x12f   :  { %1507 = vmatpush3.bf16.msra.mxu1 %v1690_v18 }
 0x130   :  { %v247_v42 = vclz %v1382_v41  ;;  %1508 = vmatprep.subr.bf16.mxu1 %v1691_v19 }
 0x132   :  { %v1383_v43 = vadd.s32 4294967294, %v247_v42 }
 0x133   :  { %1509 = vmatpush3.bf16.msra.mxu1 %v1692_v20 }
 0x134   :  { %vm1384_vm9 = vcmp.lt.s32.totalorder %v1383_v43, 0  ;;  %1510 = vmatprep.subr.bf16.mxu1 %v1693_v21 }
 0x135   :  { %v250_v44 = vsel %vm1384_vm9, 0, %v1383_v43 }
 0x136   :  { %v251_v46 = vsub.s32 32, %v250_v44  ;;  %v255_v48 = vsub.s32 4294967266, %v250_v44  ;;  %v252_v50 = vshll.u32 %v243_v38, %v250_v44  ;;  %v1710_v38 = vld [vmem:[#allocation8 + $0x80] sm:$0xff]  }
 0x138   :  { %v253_v51 = vshrl.u32 %v235_v45, %v251_v46  ;;  %v256_v53 = vadd.s32 127, %v255_v48  ;;  %v1385_v45 = vld [vmem:[%s2118_s4] ss:$0 sm:$0xff] }
 0x13a   :  { %v254_v54 = vor.u32 %v253_v51, %v252_v50  ;;  %v257_v56 = vshll.u32 %v256_v53, 23 }
 0x13c   :  { %v258_v57 = vor.u32 4788187, %v257_v56  ;;  %v261_v60 = vcvt.s32.f32 %v254_v54 }
 0x13e   :  { %v259_v58 = vand.u32 2147483647, %v258_v57 }
 0x140   :  { %v262_v61 = vmul.f32 %v261_v60, %v259_v58 }
 0x142   :  { %v263_v63 = vxor.u32 2147483648, %v262_v61 }
 0x144   :  { %v264_v1 = vsel %vm181_vm10, %v263_v63, %v262_v61 }
 0x145   :  { %v267_v2 = vsel %vm180_vm11, %v1975_v31, %v264_v1  ;;  %v1694_v31 = vld [vmem:[#allocation8 + $0x20] sm:$0xff]  }
 0x146   :  { %1739 = vcosq.f32 %v267_v2  ;;  %1511 = vmatpush3.bf16.msra.mxu1 %v1694_v31 }
 0x147   :  { %1741 = vsinq.f32 %v267_v2  ;;  %1512 = vmatprep.subr.bf16.mxu1 %v1695_v22 }
 0x14a   :  { %1513 = vmatpush3.bf16.msra.mxu1 %v1696_v23 }
 0x14b   :  { %1514 = vmatprep.subr.bf16.mxu1 %v1697_v24 }
 0x14e   :  { %1515 = vmatpush3.bf16.msra.mxu1 %v1698_v25 }
 0x14f   :  { %1516 = vmatprep.subr.bf16.mxu1 %v1699_v26 }
 0x152   :  { %1517 = vmatpush3.bf16.msra.mxu1 %v1700_v27 }
 0x153   :  { %v1740_v7 = vpop.eup %1739  ;;  %1518 = vmatprep.subr.bf16.mxu1 %v1701_v28 }
 0x154   :  { %v1742_v8 = vpop.eup %1741  ;;  %v278_v9 = vxor.u32 2147483648, %v1740_v7 }
 0x155   :  { %v275_v10 = vxor.u32 2147483648, %v1742_v8 }
 0x156   :  { %v279_v11 = vsel %vm277_vm12, %v278_v9, %v1742_v8  ;;  %1519 = vmatpush3.bf16.msra.mxu1 %v1702_v29 }
 0x157   :  { %v276_v12 = vsel %vm274_vm13, %v1740_v7, %v275_v10 }
 0x158   :  { %v280_v39 = vsel %vm273_vm14, %v276_v12, %v279_v11 }
 0x159   :  { %v281_v13 = vsel %vm271_vm15, nan, %v280_v39 }
 0x15a   :  { %v288_v14 = vpack.c.bf16 %v281_v13, %v281_v13 }
 0x15c   :  { %1591 = vmatmul.mubr.bf16.vlgmr.msra.gmra.mxu0 %v288_v14 }
 0x15d   :  { %1610 = vmatprep.mubr.msk.bf16.mxu0 %vm1873_vm0, %v1872_v0  ;;  %1595 = vmatpush3.bf16.msra.mxu0 %v1703_v30 }
 0x15e   :  { %1596 = vmatprep.subr.bf16.mxu0 %v1872_v0 }
 0x161   :  { %1597 = vmatpush3.bf16.msra.mxu0 %v1704_v32 }
 0x162   :  { %1598 = vmatprep.subr.bf16.mxu0 %v1872_v0 }
 0x165   :  { %1599 = vmatpush3.bf16.msra.mxu0 %v1705_v33 }
 0x166   :  { %1600 = vmatprep.subr.bf16.mxu0 %v1872_v0 }
 0x169   :  { %1601 = vmatpush3.bf16.msra.mxu0 %v1706_v34 }
 0x16a   :  { %1602 = vmatprep.subr.bf16.mxu0 %v1872_v0 }
 0x16d   :  { %1603 = vmatpush3.bf16.msra.mxu0 %v1707_v35 }
 0x16e   :  { %1604 = vmatprep.subr.bf16.mxu0 %v1872_v0 }
 0x171   :  { %1605 = vmatpush3.bf16.msra.mxu0 %v1708_v36 }
 0x172   :  { %1606 = vmatprep.subr.bf16.mxu0 %v1872_v0 }
 0x175   :  { %1607 = vmatpush3.bf16.msra.mxu0 %v1709_v37 }
 0x176   :  { %1608 = vmatprep.subr.bf16.mxu0 %v1872_v0 }
 0x179   :  { %1609 = vmatpush3.bf16.msra.mxu0 %v1710_v38 }
 0x17a   :  { %1614 = vmatprep.subr.bf16.mxu0 %v1872_v0 }
 0x1ea   :  { %v1489_v40 = vpop.f32.mrf.mxu1 }
 0x1ec   :  { %v1490_v41 = vpop.f32.mrf.mxu1 }
 0x1ed   :  { %v1491_v44 = vadd.f32 %v1490_v41, %v1489_v40 }
 0x1ee   :  { %v1492_v42 = vpop.f32.mrf.mxu1 }
 0x1ef   :  { %v523_v46 = vadd.f32 %v1491_v44, %v1385_v45 }
 0x1f0   :  { %v1493_v43 = vpop.f32.mrf.mxu1 }
 0x21c   :  { %v562_v48 = vpop.f32.mrf.mxu0 }
 0x21d   :  { %v2024_v50 = vadd.f32 %v562_v48, %v523_v46 }
 0x21e   :  { %v1592_v51 = vpop.f32.mrf.mxu0 }
 0x21f   :  { %v582_v53 = vand.u32 2139095040, %v2024_v50  ;;  %v1410_v54 = vmul.f32 -1.442695, %v2024_v50  ;;  %v579_v61 = vand.u32 2147483647, %v2024_v50  ;;  %vm568_vm7 = vcmp.ge.f32.partialorder %v2024_v50, 0.0 }
 0x220   :  { %v565_v56 = vpop.f32.mrf.mxu0  ;;  %v569_v42 = vmul.f32 0.01, %v2024_v50  ;;  %vm581_vm9 = vcmp.lt.s32.totalorder %v2024_v50, 0  ;;  %vm671_vm14 = vweird.f32 %v2024_v50 }
 0x221   :  { %1743 = vpow2.f32 %v1410_v54  ;;  %v583_v57 = vshrl.u32 %v582_v53, 23  ;;  %v586_v1 = vand.u32 8388607, %v579_v61  ;;  %vm580_vm10 = vcmp.le.f32.partialorder %v579_v61, 0.7853982 }
 0x222   :  { %v1593_v58 = vpop.f32.mrf.mxu0  ;;  %v570_v48 = vsel %vm568_vm7, %v2024_v50, %v569_v42  ;;  %v1722_v42 = vld [vmem:[#allocation10 + $0x10] sm:$0xff]  }
 0x223   :  { %v1411_v60 = vadd.s32 4294967169, %v583_v57  ;;  %v587_v5 = vor.u32 8388608, %v586_v1  ;;  %v686_v56 = vpack.c.bf16 %v570_v48, %v570_v48  ;;  %v1727_v48 = vld [vmem:[#allocation10 + $0xb8] sm:$0xff]  }
 0x225   :  { %v589_v63 = vadd.s32 1, %v1411_v60  ;;  %v627_v30 = vshll.u32 %v587_v5, 8 }
 0x227   :  { %vm590_vm1 = vcmp.gt.s32.totalorder %v589_v63, 0 }
 0x228   :  { %v591_v2 = vsel %vm590_vm1, %v589_v63, 0 }
 0x229   :  { %v593_v3 = vand.u32 31, %v591_v2  ;;  %v592_v6 = vshrl.u32 %v591_v2, 5 }
 0x22b   :  { %v594_v4 = vsub.s32 32, %v593_v3  ;;  %v596_v7 = vshll.u32 %v1874_v47, %v593_v3  ;;  %v599_v8 = vshll.u32 %v1875_v49, %v593_v3  ;;  %v602_v11 = vshll.u32 %v1876_v52, %v593_v3 }
 0x22c   :  { %v605_v13 = vshll.u32 %v1877_v55, %v593_v3  ;;  %v608_v15 = vshll.u32 %v1878_v59, %v593_v3  ;;  %vm611_vm2 = vcmp.lt.s32.totalorder %v592_v6, 1  ;;  %vm614_vm3 = vcmp.lt.s32.totalorder %v592_v6, 4 }
 0x22d   :  { %v597_v9 = vshrl.u32 %v1875_v49, %v594_v4  ;;  %v600_v10 = vshrl.u32 %v1876_v52, %v594_v4  ;;  %v603_v12 = vshrl.u32 %v1877_v55, %v594_v4  ;;  %v606_v14 = vshrl.u32 %v1878_v59, %v594_v4 }
 0x22e   :  { %v1744_v39 = vpop.eup %1743  ;;  %v609_v16 = vshrl.u32 %v1879_v62, %v594_v4  ;;  %v595_v22 = vshrl.u32 %v1874_v47, %v594_v4  ;;  %vm613_vm4 = vcmp.lt.s32.totalorder %v592_v6, 3  ;;  %vm612_vm5 = vcmp.lt.s32.totalorder %v592_v6, 2 }
 0x22f   :  { %v575_v17 = vadd.f32 1.0, %v1744_v39  ;;  %v598_v18 = vor.u32 %v597_v9, %v596_v7  ;;  %v601_v19 = vor.u32 %v600_v10, %v599_v8  ;;  %v604_v20 = vor.u32 %v603_v12, %v602_v11 }
 0x230   :  { %v607_v21 = vor.u32 %v606_v14, %v605_v13  ;;  %v610_v31 = vor.u32 %v609_v16, %v608_v15 }
 0x231   :  { %1745 = vrcp.f32 %v575_v17  ;;  %v616_v23 = vsel %vm614_vm3, %v604_v20, 2102212464  ;;  %v619_v24 = vsel %vm611_vm2, %v598_v18, %v601_v19  ;;  %v623_v26 = vsel %vm611_vm2, %v601_v19, %v604_v20 }
 0x232   :  { %v620_v25 = vsel %vm614_vm3, %v607_v21, 920167782  ;;  %v624_v27 = vsel %vm614_vm3, %v610_v31, 1326507024  ;;  %v615_v32 = vsel %vm611_vm2, %v595_v22, %v598_v18  ;;  %v617_v33 = vsel %vm613_vm4, %v601_v19, %v616_v23 }
 0x233   :  { %v621_v28 = vsel %vm613_vm4, %v604_v20, %v620_v25  ;;  %v625_v29 = vsel %vm613_vm4, %v607_v21, %v624_v27  ;;  %v618_v41 = vsel %vm612_vm5, %v615_v32, %v617_v33  ;;  %v1712_v32 = vld [vmem:[#allocation10 + $0x38] sm:$0xff]   ;;  %v1713_v33 = vld [vmem:[#allocation10 + $0x70] sm:$0xff]  }
 0x234   :  { %v622_v34 = vsel %vm612_vm5, %v619_v24, %v621_v28  ;;  %v626_v35 = vsel %vm612_vm5, %v623_v26, %v625_v29  ;;  %v634_v44 = vmul.u32 %v627_v30, %v618_v41  ;;  %v1721_v41 = vld [vmem:[#allocation10 + $0x50] sm:$0xff]  }
 0x235   :  { %v2042_v36 = vmul.u32.u64.low %v627_v30, %v626_v35  ;;  %v2043_v37 = vmul.u32.u64.high %v627_v30, %v626_v35, %v2042_v36  ;;  %v2045_v38 = vmul.u32.u64.low %v627_v30, %v622_v34  ;;  %v2046_v40 = vmul.u32.u64.high %v627_v30, %v622_v34, %v2045_v38  ;;  %v1711_v30 = vld [vmem:[#allocation10 + $0x78] sm:$0xff]   ;;  %v1714_v34 = vld [vmem:[#allocation10 + $0x30] sm:$0xff]   ;;  %v1715_v35 = vld [vmem:[#allocation10 + $0x68] sm:$0xff]  }
 0x236   :  { %1535 = vmatprep.subr.bf16.mxu1 %v1711_v30  ;;  %v1716_v36 = vld [vmem:[#allocation10 + $0x28] sm:$0xff]  }
 0x237   :  { %vm636_vm6 = vc.u32 %v2043_v37, %v2045_v38  ;;  %v637_v43 = vadd.s32 1, %v2046_v40  ;;  %v635_v5 = vadd.s32 %v2045_v38, %v2043_v37  ;;  %v1717_v37 = vld [vmem:[#allocation10 + $0x60] sm:$0xff]   ;;  %v1719_v38 = vld [vmem:[#allocation10 + $0x58] sm:$0xff]  }
 0x239   :  { %v638_v45 = vsel %vm636_vm6, %v637_v43, %v2046_v40  ;;  %v1720_v40 = vld [vmem:[#allocation10 + $0x18] sm:$0xff]   ;;  %v1723_v43 = vld [vmem:[#allocation10 + $0x48] sm:$0xff]  }
 0x23a   :  { %v639_v46 = vadd.s32 %v638_v45, %v634_v44  ;;  %v1724_v44 = vld [vmem:[#allocation10 + $0x8] sm:$0xff]   ;;  %v1725_v45 = vld [vmem:[#allocation10 + $0x40] sm:$0xff]  }
 0x23c   :  { %v640_v53 = vadd.s32 536870912, %v639_v46 }
 0x23e   :  { %v1746_v51 = vpop.eup %1745  ;;  %v641_v57 = vshrl.u32 %v640_v53, 30  ;;  %v1729_v53 = vld [vmem:[#allocation10 + $0xa8] sm:$0xff]  }
 0x23f   :  { %v687_v54 = vpack.c.bf16 %v1746_v51, %v1746_v51  ;;  %v1728_v51 = vld [vmem:[#allocation10 + $0xb0] sm:$0xff]  }
 0x240   :  { %v642_v58 = vshll.u32 %v641_v57, 30  ;;  %v665_v19 = vsub.s32 4, %v641_v57 }
 0x241   :  { %920 = vmatprep.mubr.bf16.mxu1 %v687_v54  ;;  %v1730_v54 = vld [vmem:[#allocation10 + $0xa0] sm:$0xff]  }
 0x242   :  { %921 = vmatmul.mubr.bf16.vlgmr.msra.gmra.mxu1 %v686_v56  ;;  %v643_v60 = vsub.s32 %v639_v46, %v642_v58  ;;  %v666_v20 = vsel %vm581_vm9, %v665_v19, %v641_v57  ;;  %v1726_v46 = vld [vmem:[#allocation10] sm:$0xff]   ;;  %v1731_v56 = vld [vmem:[#allocation10 + $0x98] sm:$0xff]   ;;  %v1732_v57 = vld [vmem:[#allocation10 + $0x90] sm:$0xff]  }
 0x243   :  { %v668_v21 = vsel %vm580_vm10, 0, %v666_v20  ;;  %1536 = vmatpush3.bf16.msra.mxu1 %v1712_v32  ;;  %v1733_v58 = vld [vmem:[#allocation10 + $0x88] sm:$0xff]  }
 0x244   :  { %v645_v63 = vsub.s32 0, %v643_v60  ;;  %v672_v31 = vand.u32 3, %v668_v21  ;;  %1537 = vmatprep.subr.bf16.mxu1 %v1713_v33 }
 0x246   :  { %v1412_v1 = vmin.u32 %v645_v63, %v643_v60  ;;  %vm677_vm11 = vcmp.eq.s32.totalorder %v672_v31, 2  ;;  %vm674_vm12 = vcmp.eq.s32.totalorder %v672_v31, 0  ;;  %vm673_vm13 = vcmp.lt.s32.totalorder %v672_v31, 2 }
 0x247   :  { %1538 = vmatpush3.bf16.msra.mxu1 %v1714_v34 }
 0x248   :  { %v647_v2 = vclz %v1412_v1  ;;  %1539 = vmatprep.subr.bf16.mxu1 %v1715_v35 }
 0x24a   :  { %v1413_v3 = vadd.s32 4294967294, %v647_v2 }
 0x24b   :  { %1540 = vmatpush3.bf16.msra.mxu1 %v1716_v36 }
 0x24c   :  { %vm1414_vm8 = vcmp.lt.s32.totalorder %v1413_v3, 0  ;;  %1541 = vmatprep.subr.bf16.mxu1 %v1717_v37 }
 0x24d   :  { %v650_v4 = vsel %vm1414_vm8, 0, %v1413_v3 }
 0x24e   :  { %v651_v6 = vsub.s32 32, %v650_v4  ;;  %v655_v7 = vsub.s32 4294967266, %v650_v4  ;;  %v652_v8 = vshll.u32 %v643_v60, %v650_v4  ;;  %v1734_v60 = vld [vmem:[#allocation10 + $0x80] sm:$0xff]  }
 0x250   :  { %v653_v9 = vshrl.u32 %v635_v5, %v651_v6  ;;  %v656_v10 = vadd.s32 127, %v655_v7  ;;  %v1415_v5 = vld [vmem:[%s2120_s6] ss:$0 sm:$0xff] }
 0x252   :  { %v654_v11 = vor.u32 %v653_v9, %v652_v8  ;;  %v657_v12 = vshll.u32 %v656_v10, 23 }
 0x254   :  { %v658_v39 = vor.u32 4788187, %v657_v12  ;;  %v661_v14 = vcvt.s32.f32 %v654_v11 }
 0x256   :  { %v659_v13 = vand.u32 2147483647, %v658_v39 }
 0x258   :  { %v662_v15 = vmul.f32 %v661_v14, %v659_v13 }
 0x25a   :  { %v663_v16 = vxor.u32 2147483648, %v662_v15 }
 0x25c   :  { %v664_v17 = vsel %vm581_vm9, %v663_v16, %v662_v15 }
 0x25d   :  { %v667_v18 = vsel %vm580_vm10, %v2024_v50, %v664_v17  ;;  %v1718_v50 = vld [vmem:[#allocation10 + $0x20] sm:$0xff]  }
 0x25e   :  { %1747 = vcosq.f32 %v667_v18  ;;  %1542 = vmatpush3.bf16.msra.mxu1 %v1718_v50 }
 0x25f   :  { %1749 = vsinq.f32 %v667_v18  ;;  %1543 = vmatprep.subr.bf16.mxu1 %v1719_v38 }
 0x262   :  { %1544 = vmatpush3.bf16.msra.mxu1 %v1720_v40 }
 0x263   :  { %1545 = vmatprep.subr.bf16.mxu1 %v1721_v41 }
 0x266   :  { %1546 = vmatpush3.bf16.msra.mxu1 %v1722_v42 }
 0x267   :  { %1547 = vmatprep.subr.bf16.mxu1 %v1723_v43 }
 0x26a   :  { %1548 = vmatpush3.bf16.msra.mxu1 %v1724_v44 }
 0x26b   :  { %v1748_v22 = vpop.eup %1747  ;;  %1549 = vmatprep.subr.bf16.mxu1 %v1725_v45 }
 0x26c   :  { %v1750_v23 = vpop.eup %1749  ;;  %v678_v24 = vxor.u32 2147483648, %v1748_v22 }
 0x26d   :  { %v675_v25 = vxor.u32 2147483648, %v1750_v23 }
 0x26e   :  { %v679_v26 = vsel %vm677_vm11, %v678_v24, %v1750_v23  ;;  %1550 = vmatpush3.bf16.msra.mxu1 %v1726_v46 }
 0x26f   :  { %v676_v27 = vsel %vm674_vm12, %v1748_v22, %v675_v25 }
 0x270   :  { %v680_v61 = vsel %vm673_vm13, %v676_v27, %v679_v26 }
 0x271   :  { %v681_v28 = vsel %vm671_vm14, nan, %v680_v61 }
 0x272   :  { %v688_v29 = vpack.c.bf16 %v681_v28, %v681_v28 }
 0x274   :  { %1611 = vmatmul.mubr.bf16.vlgmr.msra.gmra.mxu0 %v688_v29 }
 0x275   :  { %1630 = vmatprep.mubr.msk.bf16.mxu0 %vm1873_vm0, %v1872_v0  ;;  %1615 = vmatpush3.bf16.msra.mxu0 %v1727_v48 }
 0x276   :  { %1616 = vmatprep.subr.bf16.mxu0 %v1872_v0 }
 0x279   :  { %1617 = vmatpush3.bf16.msra.mxu0 %v1728_v51 }
 0x27a   :  { %1618 = vmatprep.subr.bf16.mxu0 %v1872_v0 }
 0x27d   :  { %1619 = vmatpush3.bf16.msra.mxu0 %v1729_v53 }
 0x27e   :  { %1620 = vmatprep.subr.bf16.mxu0 %v1872_v0 }
 0x281   :  { %1621 = vmatpush3.bf16.msra.mxu0 %v1730_v54 }
 0x282   :  { %1622 = vmatprep.subr.bf16.mxu0 %v1872_v0 }
 0x285   :  { %1623 = vmatpush3.bf16.msra.mxu0 %v1731_v56 }
 0x286   :  { %1624 = vmatprep.subr.bf16.mxu0 %v1872_v0 }
 0x289   :  { %1625 = vmatpush3.bf16.msra.mxu0 %v1732_v57 }
 0x28a   :  { %1626 = vmatprep.subr.bf16.mxu0 %v1872_v0 }
 0x28d   :  { %1627 = vmatpush3.bf16.msra.mxu0 %v1733_v58 }
 0x28e   :  { %1628 = vmatprep.subr.bf16.mxu0 %v1872_v0 }
 0x291   :  { %1629 = vmatpush3.bf16.msra.mxu0 %v1734_v60 }
 0x302   :  { %v1520_v63 = vpop.f32.mrf.mxu1 }
 0x304   :  { %v1521_v1 = vpop.f32.mrf.mxu1 }
 0x305   :  { %v1522_v4 = vadd.f32 %v1521_v1, %v1520_v63 }
 0x306   :  { %v1523_v2 = vpop.f32.mrf.mxu1 }
 0x307   :  { %v923_v6 = vadd.f32 %v1522_v4, %v1415_v5 }
 0x308   :  { %v1524_v3 = vpop.f32.mrf.mxu1 }
 0x334   :  { %v962_v7 = vpop.f32.mrf.mxu0 }
 0x335   :  { %v2072_v8 = vadd.f32 %v962_v7, %v923_v6 }
 0x336   :  { %v1612_v9 = vpop.f32.mrf.mxu0 }
 0x337   :  { %v982_v10 = vand.u32 2139095040, %v2072_v8  ;;  %v1440_v11 = vmul.f32 -1.442695, %v2072_v8  ;;  %v979_v14 = vand.u32 2147483647, %v2072_v8  ;;  %vm968_vm5 = vcmp.ge.f32.partialorder %v2072_v8, 0.0 }
 0x338   :  { %v965_v0 = vpop.f32.mrf.mxu0  ;;  %v969_v54 = vmul.f32 0.01, %v2072_v8  ;;  %vm981_vm7 = vcmp.lt.s32.totalorder %v2072_v8, 0  ;;  %vm1071_vm12 = vweird.f32 %v2072_v8 }
 0x339   :  { %1751 = vpow2.f32 %v1440_v11  ;;  %v983_v12 = vshrl.u32 %v982_v10, 23  ;;  %v986_v16 = vand.u32 8388607, %v979_v14  ;;  %vm980_vm8 = vcmp.le.f32.partialorder %v979_v14, 0.7853982 }
 0x33a   :  { %v1613_v39 = vpop.f32.mrf.mxu0  ;;  %v970_v63 = vsel %vm968_vm5, %v2072_v8, %v969_v54 }
 0x33b   :  { %v1441_v13 = vadd.s32 4294967169, %v983_v12  ;;  %v987_v20 = vor.u32 8388608, %v986_v16  ;;  %v1086_v4 = vpack.c.bf16 %v970_v63, %v970_v63 }
 0x33d   :  { %v989_v15 = vadd.s32 1, %v1441_v13  ;;  %v1027_v41 = vshll.u32 %v987_v20, 8 }
 0x33f   :  { %vm990_vm0 = vcmp.gt.s32.totalorder %v989_v15, 0 }
 0x340   :  { %v991_v17 = vsel %vm990_vm0, %v989_v15, 0 }
 0x341   :  { %v993_v18 = vand.u32 31, %v991_v17  ;;  %v992_v21 = vshrl.u32 %v991_v17, 5 }
 0x343   :  { %v994_v19 = vsub.s32 32, %v993_v18  ;;  %v996_v31 = vshll.u32 %v1874_v47, %v993_v18  ;;  %v999_v22 = vshll.u32 %v1875_v49, %v993_v18  ;;  %v1002_v25 = vshll.u32 %v1876_v52, %v993_v18 }
 0x344   :  { %v1005_v61 = vshll.u32 %v1877_v55, %v993_v18  ;;  %v1008_v29 = vshll.u32 %v1878_v59, %v993_v18  ;;  %vm1011_vm15 = vcmp.lt.s32.totalorder %v992_v21, 1  ;;  %vm1014_vm1 = vcmp.lt.s32.totalorder %v992_v21, 4 }
 0x345   :  { %v997_v23 = vshrl.u32 %v1875_v49, %v994_v19  ;;  %v1000_v24 = vshrl.u32 %v1876_v52, %v994_v19  ;;  %v1003_v26 = vshrl.u32 %v1877_v55, %v994_v19  ;;  %v1006_v28 = vshrl.u32 %v1878_v59, %v994_v19 }
 0x346   :  { %v1752_v27 = vpop.eup %1751  ;;  %v1009_v30 = vshrl.u32 %v1879_v62, %v994_v19  ;;  %v995_v52 = vshrl.u32 %v1874_v47, %v994_v19  ;;  %vm1013_vm2 = vcmp.lt.s32.totalorder %v992_v21, 3  ;;  %vm1012_vm3 = vcmp.lt.s32.totalorder %v992_v21, 2 }
 0x347   :  { %v975_v32 = vadd.f32 1.0, %v1752_v27  ;;  %v998_v33 = vor.u32 %v997_v23, %v996_v31  ;;  %v1001_v34 = vor.u32 %v1000_v24, %v999_v22  ;;  %v1004_v35 = vor.u32 %v1003_v26, %v1002_v25 }
 0x348   :  { %v1007_v49 = vor.u32 %v1006_v28, %v1005_v61  ;;  %v1010_v36 = vor.u32 %v1009_v30, %v1008_v29 }
 0x349   :  { %1753 = vrcp.f32 %v975_v32  ;;  %v1016_v37 = vsel %vm1014_vm1, %v1004_v35, 2102212464  ;;  %v1019_v50 = vsel %vm1011_vm15, %v998_v33, %v1001_v34  ;;  %v1023_v38 = vsel %vm1011_vm15, %v1001_v34, %v1004_v35 }
 0x34a   :  { %v1020_v55 = vsel %vm1014_vm1, %v1007_v49, 920167782  ;;  %v1024_v40 = vsel %vm1014_vm1, %v1010_v36, 1326507024  ;;  %v1015_v42 = vsel %vm1011_vm15, %v995_v52, %v998_v33  ;;  %v1017_v43 = vsel %vm1013_vm2, %v1001_v34, %v1016_v37 }
 0x34b   :  { %v1021_v59 = vsel %vm1013_vm2, %v1004_v35, %v1020_v55  ;;  %v1025_v62 = vsel %vm1013_vm2, %v1007_v49, %v1024_v40  ;;  %v1018_v47 = vsel %vm1012_vm3, %v1015_v42, %v1017_v43 }
 0x34c   :  { %v1022_v44 = vsel %vm1012_vm3, %v1019_v50, %v1021_v59  ;;  %v1026_v45 = vsel %vm1012_vm3, %v1023_v38, %v1025_v62  ;;  %v1034_v57 = vmul.u32 %v1027_v41, %v1018_v47  ;;  %v1445_v59 = vld [vmem:[%s2122_s8] ss:$0 sm:$0xff] }
 0x34d   :  { %v2090_v46 = vmul.u32.u64.low %v1027_v41, %v1026_v45  ;;  %v2091_v48 = vmul.u32.u64.high %v1027_v41, %v1026_v45, %v2090_v46  ;;  %v2093_v51 = vmul.u32.u64.low %v1027_v41, %v1022_v44  ;;  %v2094_v53 = vmul.u32.u64.high %v1027_v41, %v1022_v44, %v2093_v51 }
 0x34f   :  { %vm1036_vm4 = vc.u32 %v2091_v48, %v2093_v51  ;;  %v1037_v56 = vadd.s32 1, %v2094_v53  ;;  %v1035_v39 = vadd.s32 %v2093_v51, %v2091_v48 }
 0x351   :  { %v1038_v58 = vsel %vm1036_vm4, %v1037_v56, %v2094_v53 }
 0x352   :  { %v1039_v60 = vadd.s32 %v1038_v58, %v1034_v57 }
 0x354   :  { %v1040_v2 = vadd.s32 536870912, %v1039_v60 }
 0x356   :  { %v1754_v1 = vpop.eup %1753  ;;  %v1041_v5 = vshrl.u32 %v1040_v2, 30 }
 0x357   :  { %v1087_v3 = vpack.c.bf16 %v1754_v1, %v1754_v1 }
 0x358   :  { %v1042_v6 = vshll.u32 %v1041_v5, 30  ;;  %v1065_v27 = vsub.s32 4, %v1041_v5 }
 0x359   :  { %1320 = vmatprep.mubr.bf16.mxu1 %v1087_v3 }
 0x35a   :  { %1321 = vmatmul.mubr.bf16.vlgmr.msra.gmra.mxu1 %v1086_v4  ;;  %v1043_v7 = vsub.s32 %v1039_v60, %v1042_v6  ;;  %v1066_v61 = vsel %vm981_vm7, %v1065_v27, %v1041_v5 }
 0x35b   :  { %v1068_v28 = vsel %vm980_vm8, 0, %v1066_v61 }
 0x35c   :  { %v1045_v9 = vsub.s32 0, %v1043_v7  ;;  %v1072_v29 = vand.u32 3, %v1068_v28 }
 0x35e   :  { %v1442_v10 = vmin.u32 %v1045_v9, %v1043_v7  ;;  %vm1077_vm9 = vcmp.eq.s32.totalorder %v1072_v29, 2  ;;  %vm1074_vm10 = vcmp.eq.s32.totalorder %v1072_v29, 0  ;;  %vm1073_vm11 = vcmp.lt.s32.totalorder %v1072_v29, 2 }
 0x360   :  { %v1047_v11 = vclz %v1442_v10 }
 0x362   :  { %v1443_v0 = vadd.s32 4294967294, %v1047_v11 }
 0x364   :  { %vm1444_vm6 = vcmp.lt.s32.totalorder %v1443_v0, 0 }
 0x365   :  { %v1050_v12 = vsel %vm1444_vm6, 0, %v1443_v0 }
 0x366   :  { %v1051_v13 = vsub.s32 32, %v1050_v12  ;;  %v1055_v15 = vsub.s32 4294967266, %v1050_v12  ;;  %v1052_v16 = vshll.u32 %v1043_v7, %v1050_v12 }
 0x368   :  { %v1053_v17 = vshrl.u32 %v1035_v39, %v1051_v13  ;;  %v1056_v18 = vadd.s32 127, %v1055_v15 }
 0x36a   :  { %v1054_v19 = vor.u32 %v1053_v17, %v1052_v16  ;;  %v1057_v20 = vshll.u32 %v1056_v18, 23 }
 0x36c   :  { %v1058_v21 = vor.u32 4788187, %v1057_v20  ;;  %v1061_v22 = vcvt.s32.f32 %v1054_v19 }
 0x36e   :  { %v1059_v31 = vand.u32 2147483647, %v1058_v21 }
 0x370   :  { %v1062_v23 = vmul.f32 %v1061_v22, %v1059_v31 }
 0x372   :  { %v1063_v24 = vxor.u32 2147483648, %v1062_v23 }
 0x374   :  { %v1064_v25 = vsel %vm981_vm7, %v1063_v24, %v1062_v23 }
 0x375   :  { %v1067_v26 = vsel %vm980_vm8, %v2072_v8, %v1064_v25 }
 0x376   :  { %1755 = vcosq.f32 %v1067_v26 }
 0x377   :  { %1757 = vsinq.f32 %v1067_v26 }
 0x383   :  { %v1756_v30 = vpop.eup %1755 }
 0x384   :  { %v1758_v32 = vpop.eup %1757  ;;  %v1078_v33 = vxor.u32 2147483648, %v1756_v30 }
 0x385   :  { %v1075_v34 = vxor.u32 2147483648, %v1758_v32 }
 0x386   :  { %v1079_v35 = vsel %vm1077_vm9, %v1078_v33, %v1758_v32 }
 0x387   :  { %v1076_v49 = vsel %vm1074_vm10, %v1756_v30, %v1075_v34 }
 0x388   :  { %v1080_v14 = vsel %vm1073_vm11, %v1076_v49, %v1079_v35 }
 0x389   :  { %v1081_v36 = vsel %vm1071_vm12, nan, %v1080_v14 }
 0x38a   :  { %v1088_v52 = vpack.c.bf16 %v1081_v36, %v1081_v36 }
 0x38c   :  { %1631 = vmatmul.mubr.bf16.vlgmr.msra.gmra.mxu0 %v1088_v52 }
 0x41a   :  { %v1551_v37 = vpop.f32.mrf.mxu1 }
 0x41c   :  { %v1552_v50 = vpop.f32.mrf.mxu1 }
 0x41d   :  { %v1553_v40 = vadd.f32 %v1552_v50, %v1551_v37 }
 0x41e   :  { %v1554_v55 = vpop.f32.mrf.mxu1 }
 0x41f   :  { %v1323_v62 = vadd.f32 %v1553_v40, %v1445_v59 }
 0x420   :  { %v1555_v38 = vpop.f32.mrf.mxu1 }
 0x44c   :  { %v1362_v41 = vpop.f32.mrf.mxu0 }
 0x44d   :  { %v1363_v42 = vadd.f32 %v1362_v41, %v1323_v62 }
 0x44e   :  { %v1632_v43 = vpop.f32.mrf.mxu0 }
 0x44f   :  { %1368 = vst [vmem:[%s2123_s9] sm:$0xff] %v1363_v42 }
 0x450   :  { %v1365_v8 = vpop.f32.mrf.mxu0 }
 0x452   :  { %v1633_v44 = vpop.f32.mrf.mxu0 }
 0x453   :  { %1373 = vsyncpa [#allocation4], 1 }
 0x454   :  { %1374 = vsyncpa [#allocation6], 1 }
 0x455   :  { %1375 = vsyncpa [#allocation9], 1 }

</bundles_post_ra>
